<compile_context>
chip_gen: v6e
topology: v6e:2x2x1
jax: 0.10.0
libtpu: 0.0.40
codegen_flags: <defaults>
</compile_context>

<pallas_src>
import functools
import math

import jax
import jax.numpy as jnp
from jax.experimental import pallas as pl
from jax.experimental.pallas import tpu as pltpu

LANES = 128
MAX_TILE_ROWS = 4096                 # 4096 x 128 f32 = 2 MiB per pipeline buffer
VMEM_LIMIT_BYTES = 32 * 1024 * 1024  # >= worst-case ~12 MiB, <= every gen's VMEM
SMALL_PARAM_ELEMS = 1024             # below this, regularization stays in XLA


def _cdiv(a, b):
    return -(-a // b)


def _round_up(x, m):
    return _cdiv(x, m) * m


def _sublane_multiple(dtype):
    return {4: 8, 2: 16, 1: 32}[jnp.dtype(dtype).itemsize]


def _stream_dtype(x):
    return x.dtype if x.dtype in (jnp.bfloat16, jnp.float32) else jnp.float32


def _num_tensorcores():
    """2 TensorCores on v7x, 1 on v5e/v6e (safe fallback = 1)."""
    try:
        kind = jax.devices()[0].device_kind.lower()
    except Exception:
        return 1
    return 2 if ("v7" in kind or "7x" in kind) else 1


def _to_slab(x, dtype, rows_p):
    """Flatten into a lane-dense (rows_p, 128) slab with minimal zero pad."""
    flat = jnp.ravel(x).astype(dtype)
    pad = rows_p * LANES - flat.shape[0]
    if pad:
        flat = jnp.pad(flat, (0, pad))
    return flat.reshape(rows_p, LANES)


def _per_row_weights(weights, pred_shape):
    """If broadcast(weights) is constant within every flattened group of 128
    elements, return the per-row weight vector (length = n // 128); else None."""
    ndim = len(pred_shape)
    if weights.ndim > ndim:
        return None
    w_aligned_shape = (1,) * (ndim - weights.ndim) + tuple(weights.shape)
    split = ndim
    while split > 0 and w_aligned_shape[split - 1] == 1:
        split -= 1
    g = int(math.prod(pred_shape[split:]))  # contiguous run with constant weight
    if g % LANES != 0:
        return None
    w_aligned = jnp.reshape(weights, w_aligned_shape)
    lead_shape = tuple(pred_shape[:split])
    w_lead = jnp.ravel(
        jnp.broadcast_to(w_aligned, lead_shape + (1,) * (ndim - split))
    ).astype(jnp.float32)
    return jnp.repeat(w_lead, g // LANES)   # length == n // 128


def _accumulate_tile(out_ref, tile, row_start, tile_r, rows_valid):
    """out_ref (8,128) += vreg-wise sum of `tile` (tile_r,128); masks rows that
    fall beyond `rows_valid` (partial / out-of-range boundary block)."""

    def _acc(t):
        out_ref[...] += t.reshape(tile_r // 8, 8, LANES).sum(axis=0)

    interior = row_start + tile_r <= rows_valid

    @pl.when(interior)
    def _():
        _acc(tile)

    @pl.when(jnp.logical_not(interior))
    def _():
        valid = rows_valid - row_start     # may be <= 0 for fully-OOB blocks
        mask = jax.lax.broadcasted_iota(jnp.int32, tile.shape, 0) < valid
        _acc(jnp.where(mask, tile, 0.0))


# --------------------------------------------------------------------------
# main weighted-loss kernel
# --------------------------------------------------------------------------
def _weighted_loss_kernel(*refs, loss_type, loss_lambda, weight_mode,
                          tile_r, steps, rows_valid):
    if weight_mode == "none":
        pred_ref, tgt_ref, out_ref = refs
        w_ref = None
    else:
        pred_ref, tgt_ref, w_ref, out_ref = refs

    c = pl.program_id(0)
    i = pl.program_id(1)

    @pl.when(i == 0)
    def _():
        out_ref[...] = jnp.zeros_like(out_ref)

    d = pred_ref[...].astype(jnp.float32) - tgt_ref[...].astype(jnp.float32)
    ab = jnp.abs(d)

    if loss_type == "weighted_RMSE":
        # elementwise sqrt((p - t)^2) == |p - t|  (VPU abs, no EUP sqrt)
        loss = ab
    elif loss_type == "weighted_MSE":
        loss = d * d
    elif loss_type == "weighted_MAE":
        loss = ab
    elif loss_type == "weighted_MAE+MSE":
        loss = ab + loss_lambda * (d * d)
    elif loss_type == "weighted_MAE+RMSE":
        loss = (1.0 + loss_lambda) * ab
    else:
        raise ValueError(f"Unsupported loss type: {loss_type}")

    if weight_mode != "none":
        # (tile_r, 1) per-row column lane-broadcasts; full slab multiplies 1:1
        loss = loss * w_ref[...].astype(jnp.float32)

    row_start = (c * steps + i) * tile_r
    _accumulate_tile(out_ref, loss, row_start, tile_r, rows_valid)


def weighted_loss_pallas(prediction, target, weights=None,
                         loss_type="weighted_RMSE", loss_lambda=1.0,
                         max_tile_rows=MAX_TILE_ROWS, nsplit=None):
    n = int(math.prod(prediction.shape))
    pred_dt = _stream_dtype(prediction)
    tgt_dt = _stream_dtype(target)

    # ---- weight mode -------------------------------------------------------
    weight_mode = "none"
    w_rows = None
    w_full = None
    w_dt = jnp.float32
    if weights is not None:
        w_rows = _per_row_weights(weights, prediction.shape)
        if w_rows is not None:
            weight_mode = "per_row"
        else:
            weight_mode = "full"
            w_full = weights if tuple(weights.shape) == tuple(prediction.shape) \
                else jnp.broadcast_to(weights, prediction.shape)
            w_dt = _stream_dtype(w_full)

    # ---- tiling ------------------------------------------------------------
    sub = max(_sublane_multiple(pred_dt), _sublane_multiple(tgt_dt),
              _sublane_multiple(w_dt) if weight_mode == "full" else 8)
    align = sub * LANES
    n_pad = _round_up(n, align)              # at most sub*128-1 extra elements
    rows_p = n_pad // LANES

    tile_r = min(_round_up(max_tile_rows, sub), rows_p)
    blocks_total = _cdiv(rows_p, tile_r)

    cores = _num_tensorcores()
    if nsplit is None:
        nsplit = cores
    nsplit = max(1, min(int(nsplit), blocks_total))
    steps = _cdiv(blocks_total, nsplit)

    # ---- host-side views (no large padding, native dtypes) ------------------
    pred2d = _to_slab(prediction, pred_dt, rows_p)
    tgt2d = _to_slab(target, tgt_dt, rows_p)

    if nsplit * steps == blocks_total:
        def row_map(c, i):
            return (c * steps + i, 0)
    else:
        # last split may run past the end; clamp (masked to zero in-kernel)
        def row_map(c, i):
            return (jnp.minimum(c * steps + i, blocks_total - 1), 0)

    w_args, w_specs, w_bytes = (), (), 0
    if weight_mode == "per_row":
        pad = rows_p - w_rows.shape[0]
        w_col = (jnp.pad(w_rows, (0, pad)) if pad else w_rows).reshape(rows_p, 1)
        w_args = (w_col,)
        w_specs = (pl.BlockSpec((tile_r, 1), row_map),)
        w_bytes = rows_p * 4
    elif weight_mode == "full":
        w2d = _to_slab(w_full, w_dt, rows_p)
        w_args = (w2d,)
        w_specs = (pl.BlockSpec((tile_r, LANES), row_map),)
        w_bytes = n_pad * jnp.dtype(w_dt).itemsize

    kernel = functools.partial(
        _weighted_loss_kernel,
        loss_type=loss_type, loss_lambda=float(loss_lambda),
        weight_mode=weight_mode, tile_r=tile_r, steps=steps, rows_valid=rows_p)

    if nsplit > 1 and cores > 1:
        core_par = getattr(pltpu, "CORE_PARALLEL", None)
        if core_par is not None:
            dim_sem = (core_par, pltpu.ARBITRARY)
        else:
            dim_sem = ("parallel", "arbitrary")
    else:
        dim_sem = ("arbitrary", "arbitrary")

    cost = pl.CostEstimate(
        flops=6 * n, transcendentals=0,
        bytes_accessed=(n_pad * (jnp.dtype(pred_dt).itemsize
                                 + jnp.dtype(tgt_dt).itemsize)
                        + w_bytes + nsplit * 8 * LANES * 4))

    in_specs = [pl.BlockSpec((tile_r, LANES), row_map),
                pl.BlockSpec((tile_r, LANES), row_map),
                *w_specs]

    partials = pl.pallas_call(
        kernel,
        out_shape=jax.ShapeDtypeStruct((nsplit * 8, LANES), jnp.float32),
        grid_spec=pltpu.PrefetchScalarGridSpec(
            num_scalar_prefetch=0,
            grid=(nsplit, steps),
            in_specs=in_specs,
            out_specs=pl.BlockSpec((8, LANES), lambda c, i: (c, 0))),
        compiler_params=pltpu.CompilerParams(
            dimension_semantics=dim_sem,
            vmem_limit_bytes=VMEM_LIMIT_BYTES),
        cost_estimate=cost,
    )(pred2d, tgt2d, *w_args)

    return jnp.sum(partials) * (1.0 / n)


# --------------------------------------------------------------------------
# regularization penalty: one small Pallas reduction per large parameter
# --------------------------------------------------------------------------
def _reg_kernel(p_ref, out_ref, *, mode, tile_r, rows_valid):
    i = pl.program_id(0)

    @pl.when(i == 0)
    def _():
        out_ref[...] = jnp.zeros_like(out_ref)

    x = p_ref[...].astype(jnp.float32)
    if mode == "L1":
        term = jnp.abs(x)
    elif mode == "L2":
        term = x * x
    elif mode == "L1+L2":
        term = jnp.abs(x) + x * x
    else:
        raise ValueError(f"Unsupported regularization type: {mode}")

    _accumulate_tile(out_ref, term, i * tile_r, tile_r, rows_valid)


def _reg_reduce_pallas(p, mode, max_tile_rows=MAX_TILE_ROWS):
    dt = _stream_dtype(p)
    sub = _sublane_multiple(dt)
    n = int(math.prod(p.shape))
    n_pad = _round_up(n, sub * LANES)
    rows_p = n_pad // LANES
    tile_r = min(_round_up(max_tile_rows, sub), rows_p)
    steps = _cdiv(rows_p, tile_r)
    slab = _to_slab(p, dt, rows_p)

    cost = pl.CostEstimate(
        flops=3 * n, transcendentals=0,
        bytes_accessed=n_pad * jnp.dtype(dt).itemsize + 8 * LANES * 4)

    partial = pl.pallas_call(
        functools.partial(_reg_kernel, mode=mode, tile_r=tile_r, rows_valid=rows_p),
        out_shape=jax.ShapeDtypeStruct((8, LANES), jnp.float32),
        grid_spec=pltpu.PrefetchScalarGridSpec(
            num_scalar_prefetch=0,
            grid=(steps,),
            in_specs=[pl.BlockSpec((tile_r, LANES), lambda i: (i, 0))],
            out_specs=pl.BlockSpec((8, LANES), lambda i: (0, 0))),
        compiler_params=pltpu.CompilerParams(
            dimension_semantics=("arbitrary",),
            vmem_limit_bytes=VMEM_LIMIT_BYTES),
        cost_estimate=cost,
    )(slab)
    return jnp.sum(partial)


def _reg_small(p, mode):
    x = jnp.ravel(p).astype(jnp.float32)
    if mode == "L1":
        return jnp.sum(jnp.abs(x))
    if mode == "L2":
        return jnp.sum(x * x)
    if mode == "L1+L2":
        return jnp.sum(jnp.abs(x)) + jnp.sum(x * x)
    raise ValueError(f"Unsupported regularization type: {mode}")


def regularization_penalty_pallas(model_params, regular_type):
    total = jnp.zeros((), jnp.float32)
    for p in model_params:
        n = int(math.prod(p.shape))
        if n < SMALL_PARAM_ELEMS:
            total = total + _reg_small(p, regular_type)   # tiny: stay in XLA
        else:
            total = total + _reg_reduce_pallas(p, regular_type)
    return total


# --------------------------------------------------------------------------
# module-equivalent wrapper
# --------------------------------------------------------------------------
class CustomWeightedLossFunctionPallas:
    def __init__(self, loss_type='weighted_RMSE', loss_lambda=1.0,
                 regular_type=None, regular_lambda=1e-05):
        self.loss_type = loss_type
        self.loss_lambda = loss_lambda
        self.regular_type = regular_type
        self.regular_lambda = regular_lambda
        self.penalty_value = None
        self.loss = None

    def __call__(self, prediction, target, model_params=None, weights=None):
        self.loss = weighted_loss_pallas(
            prediction, target, weights,
            loss_type=self.loss_type, loss_lambda=self.loss_lambda)

        if self.regular_type and model_params:
            reg = regularization_penalty_pallas(model_params, self.regular_type)
            self.penalty_value = self.regular_lambda * reg
            return self.loss + self.penalty_value
        return self.loss


# --------------------------------------------------------------------------
if __name__ == "__main__":
    key = jax.random.PRNGKey(0)
    k1, k2, k3, k4, k5, k6, k7 = jax.random.split(key, 7)

    B, C, H, W = 2, 4, 16, 16
    prediction = jax.random.normal(k1, (B, C, H, W), dtype=jnp.float32)
    target = jax.random.normal(k2, (B, C, H, W), dtype=jnp.float32)
    weights = jax.random.uniform(k3, (B, 1, 1, 1), dtype=jnp.float32)

    params = [jax.random.normal(k4, (32, 64), dtype=jnp.float32),
              jnp.full((64,), 0.1, dtype=jnp.float32)]

    def ref_loss(pred, tgt, w, lt, lam):
        pred = pred.astype(jnp.float32)
        tgt = tgt.astype(jnp.float32)
        d = pred - tgt
        mse = d * d
        mae = jnp.abs(d)
        if lt == 'weighted_RMSE':
            l = jnp.sqrt(mse)
        elif lt == 'weighted_MSE':
            l = mse
        elif lt == 'weighted_MAE':
            l = mae
        elif lt == 'weighted_MAE+MSE':
            l = mae + lam * mse
        elif lt == 'weighted_MAE+RMSE':
            l = mae + lam * jnp.sqrt(mse)
        if w is not None:
            l = l * jnp.broadcast_to(w.astype(jnp.float32), pred.shape)
        return jnp.mean(l)

    ok = True

    # all loss types, per-batch weights (per-row fast path)
    for lt in ['weighted_RMSE', 'weighted_MSE', 'weighted_MAE',
               'weighted_MAE+MSE', 'weighted_MAE+RMSE']:
        fn = CustomWeightedLossFunctionPallas(loss_type=lt, loss_lambda=0.7)
        got = fn(prediction, target, weights=weights)
        exp = ref_loss(prediction, target, weights, lt, 0.7)
        jax.block_until_ready(got)
        ok &= bool(jnp.allclose(got, exp, rtol=1e-5, atol=1e-6))

    # no-weights variant (2-stream kernel)
    fn = CustomWeightedLossFunctionPallas(loss_type='weighted_MSE')
    got = fn(prediction, target)
    exp = ref_loss(prediction, target, None, 'weighted_MSE', 1.0)
    jax.block_until_ready(got)
    ok &= bool(jnp.allclose(got, exp, rtol=1e-5, atol=1e-6))

    # full-shape weights (3-stream kernel, native dtypes)
    w_full = jax.random.uniform(k5, (B, C, H, W), dtype=jnp.float32)
    fn = CustomWeightedLossFunctionPallas(loss_type='weighted_MAE')
    got = fn(prediction, target, weights=w_full)
    exp = ref_loss(prediction, target, w_full, 'weighted_MAE', 1.0)
    jax.block_until_ready(got)
    ok &= bool(jnp.allclose(got, exp, rtol=1e-5, atol=1e-6))

    # mixed-dtype streams (bf16 prediction, f32 target)
    pred_bf16 = prediction.astype(jnp.bfloat16)
    got = weighted_loss_pallas(pred_bf16, target, weights,
                               loss_type='weighted_MSE', loss_lambda=1.0)
    exp = ref_loss(pred_bf16, target, weights, 'weighted_MSE', 1.0)
    jax.block_until_ready(got)
    ok &= bool(jnp.allclose(got, exp, rtol=1e-5, atol=1e-6))

    # ragged n (not a multiple of 128) + masked partial boundary block
    p_r = jax.random.normal(k6, (2, 4, 16, 23), dtype=jnp.float32)
    t_r = jax.random.normal(k7, (2, 4, 16, 23), dtype=jnp.float32)
    got = weighted_loss_pallas(p_r, t_r, None, loss_type='weighted_MAE',
                               max_tile_rows=16)
    exp = ref_loss(p_r, t_r, None, 'weighted_MAE', 1.0)
    jax.block_until_ready(got)
    ok &= bool(jnp.allclose(got, exp, rtol=1e-5, atol=1e-6))

    # forced 2-way split with odd block count (exercises clamp + OOB mask)
    p_s = jax.random.normal(k6, (2, 5, 16, 32), dtype=jnp.float32)
    t_s = jax.random.normal(k7, (2, 5, 16, 32), dtype=jnp.float32)
    got = weighted_loss_pallas(p_s, t_s, None, loss_type='weighted_MAE+MSE',
                               loss_lambda=0.3, max_tile_rows=16, nsplit=2)
    exp = ref_loss(p_s, t_s, None, 'weighted_MAE+MSE', 0.3)
    jax.block_until_ready(got)
    ok &= bool(jnp.allclose(got, exp, rtol=1e-5, atol=1e-6))

    # regularized variant (per-parameter reg kernels, tiny params in XLA)
    fn = CustomWeightedLossFunctionPallas(
        loss_type='weighted_MSE', regular_type='L1+L2', regular_lambda=1e-5)
    got = fn(prediction, target, model_params=params, weights=weights)
    reg = sum(jnp.sum(jnp.abs(p)) + jnp.sum(p * p) for p in params)
    exp = ref_loss(prediction, target, weights, 'weighted_MSE', 1.0) + 1e-5 * reg
    jax.block_until_ready(got)
    ok &= bool(jnp.allclose(got, exp, rtol=1e-5, atol=1e-6))

    assert ok, "Pallas loss does not match pure-JAX reference"
    print("KERNEL_OK")
</pallas_src>

<mosaic_0001>
module attributes {stable_mosaic.version = 11 : i64} {
  func.func @_weighted_loss_kernel(%arg0: i32, %arg1: i32, %arg2: memref<16x128xf32, #tpu.memory_space<vmem>>, %arg3: memref<16x128xf32, #tpu.memory_space<vmem>>, %arg4: memref<16x1xf32, #tpu.memory_space<vmem>>, %arg5: memref<8x128xf32, #tpu.memory_space<vmem>>) attributes {dimension_semantics = [#tpu.dimension_semantics<arbitrary>, #tpu.dimension_semantics<arbitrary>], iteration_bounds = array<i64: 1, 1>, scalar_prefetch = 0 : i64, scratch_operands = 0 : i64, tpu.core_type = #tpu.core_type<tc>, window_params = [{transform_indices = @transform_0, window_bounds = array<i64: 16, 128>}, {transform_indices = @transform_1, window_bounds = array<i64: 16, 128>}, {transform_indices = @transform_2, window_bounds = array<i64: 16, 1>}, {transform_indices = @transform_3, window_bounds = array<i64: 8, 128>}]} {
    %c0_i32 = arith.constant 0 : i32
    %0 = arith.cmpi eq, %arg1, %c0_i32 : i32
    %1 = arith.extui %0 : i1 to i32
    %c0_i32_0 = arith.constant 0 : i32
    %2 = arith.cmpi ne, %1, %c0_i32_0 : i32
    scf.if %2 {
      %cst = arith.constant 0.000000e+00 : f32
      %20 = vector.broadcast %cst : f32 to vector<8x128xf32>
      %c0_10 = arith.constant 0 : index
      %c0_11 = arith.constant 0 : index
      %21 = vector.load %arg5[%c0_10, %c0_11] : memref<8x128xf32, #tpu.memory_space<vmem>>, vector<8x128xf32>
      tpu.vector_store %arg5[%c0_10, %c0_11], %20 {strides = array<i32>} : memref<8x128xf32, #tpu.memory_space<vmem>>, vector<8x128xf32>,
    } else {
    }
    %c0 = arith.constant 0 : index
    %c0_1 = arith.constant 0 : index
    %3 = vector.load %arg2[%c0, %c0_1] : memref<16x128xf32, #tpu.memory_space<vmem>>, vector<16x128xf32>
    %c0_2 = arith.constant 0 : index
    %c0_3 = arith.constant 0 : index
    %4 = vector.load %arg3[%c0_2, %c0_3] : memref<16x128xf32, #tpu.memory_space<vmem>>, vector<16x128xf32>
    %5 = arith.subf %3, %4 : vector<16x128xf32>
    %6 = math.absf %5 : vector<16x128xf32>
    %c0_4 = arith.constant 0 : index
    %c0_5 = arith.constant 0 : index
    %7 = vector.load %arg4[%c0_4, %c0_5] : memref<16x1xf32, #tpu.memory_space<vmem>>, vector<16x1xf32>
    %8 = vector.broadcast %7 : vector<16x1xf32> to vector<16x128xf32>
    %9 = arith.mulf %6, %8 : vector<16x128xf32>
    %c1_i32 = arith.constant 1 : i32
    %10 = arith.muli %arg0, %c1_i32 : i32
    %11 = arith.addi %10, %arg1 : i32
    %c16_i32 = arith.constant 16 : i32
    %12 = arith.muli %11, %c16_i32 : i32
    %c16_i32_6 = arith.constant 16 : i32
    %13 = arith.addi %12, %c16_i32_6 : i32
    %c16_i32_7 = arith.constant 16 : i32
    %14 = arith.cmpi sle, %13, %c16_i32_7 : i32
    %15 = arith.extui %14 : i1 to i32
    %c0_i32_8 = arith.constant 0 : i32
    %16 = arith.cmpi ne, %15, %c0_i32_8 : i32
    scf.if %16 {
      %c0_10 = arith.constant 0 : index
      %c0_11 = arith.constant 0 : index
      %20 = vector.load %arg5[%c0_10, %c0_11] : memref<8x128xf32, #tpu.memory_space<vmem>>, vector<8x128xf32>
      %21 = vector.shape_cast %9 : vector<16x128xf32> to vector<2x8x128xf32>
      %cst = arith.constant dense<0.000000e+00> : vector<8x128xf32>
      %22 = vector.multi_reduction <add>, %21, %cst [0] : vector<2x8x128xf32> to vector<8x128xf32>
      %23 = arith.addf %20, %22 : vector<8x128xf32>
      %c0_12 = arith.constant 0 : index
      %c0_13 = arith.constant 0 : index
      %24 = vector.load %arg5[%c0_12, %c0_13] : memref<8x128xf32, #tpu.memory_space<vmem>>, vector<8x128xf32>
      tpu.vector_store %arg5[%c0_12, %c0_13], %23 {strides = array<i32>} : memref<8x128xf32, #tpu.memory_space<vmem>>, vector<8x128xf32>,
    } else {
    }
    %true = arith.constant true
    %17 = arith.xori %14, %true : i1
    %18 = arith.extui %17 : i1 to i32
    %c0_i32_9 = arith.constant 0 : i32
    %19 = arith.cmpi ne, %18, %c0_i32_9 : i32
    scf.if %19 {
      %c16_i32_10 = arith.constant 16 : i32
      %20 = arith.subi %c16_i32_10, %12 : i32
      %21 = tpu.iota {dimensions = array<i32: 0>} : vector<16x128xi32>
      %22 = vector.broadcast %20 : i32 to vector<16x128xi32>
      %23 = arith.cmpi slt, %21, %22 : vector<16x128xi32>
      %cst = arith.constant 0.000000e+00 : f32
      %24 = vector.broadcast %cst : f32 to vector<16x128xf32>
      %25 = arith.select %23, %9, %24 : vector<16x128xi1>, vector<16x128xf32>
      %c0_11 = arith.constant 0 : index
      %c0_12 = arith.constant 0 : index
      %26 = vector.load %arg5[%c0_11, %c0_12] : memref<8x128xf32, #tpu.memory_space<vmem>>, vector<8x128xf32>
      %27 = vector.shape_cast %25 : vector<16x128xf32> to vector<2x8x128xf32>
      %cst_13 = arith.constant dense<0.000000e+00> : vector<8x128xf32>
      %28 = vector.multi_reduction <add>, %27, %cst_13 [0] : vector<2x8x128xf32> to vector<8x128xf32>
      %29 = arith.addf %26, %28 : vector<8x128xf32>
      %c0_14 = arith.constant 0 : index
      %c0_15 = arith.constant 0 : index
      %30 = vector.load %arg5[%c0_14, %c0_15] : memref<8x128xf32, #tpu.memory_space<vmem>>, vector<8x128xf32>
      tpu.vector_store %arg5[%c0_14, %c0_15], %29 {strides = array<i32>} : memref<8x128xf32, #tpu.memory_space<vmem>>, vector<8x128xf32>,
    } else {
    }
    return
  }
  func.func @transform_0(%arg0: i32, %arg1: i32) -> (i32, i32) {
    %c1_i32 = arith.constant 1 : i32
    %0 = arith.muli %arg0, %c1_i32 : i32
    %1 = arith.addi %0, %arg1 : i32
    %c0_i32 = arith.constant 0 : i32
    %c0_i32_0 = arith.constant 0 : i32
    return %1, %c0_i32 : i32, i32
  }
  func.func @transform_1(%arg0: i32, %arg1: i32) -> (i32, i32) {
    %c1_i32 = arith.constant 1 : i32
    %0 = arith.muli %arg0, %c1_i32 : i32
    %1 = arith.addi %0, %arg1 : i32
    %c0_i32 = arith.constant 0 : i32
    %c0_i32_0 = arith.constant 0 : i32
    return %1, %c0_i32 : i32, i32
  }
  func.func @transform_2(%arg0: i32, %arg1: i32) -> (i32, i32) {
    %c1_i32 = arith.constant 1 : i32
    %0 = arith.muli %arg0, %c1_i32 : i32
    %1 = arith.addi %0, %arg1 : i32
    %c0_i32 = arith.constant 0 : i32
    %c0_i32_0 = arith.constant 0 : i32
    return %1, %c0_i32 : i32, i32
  }
  func.func @transform_3(%arg0: i32, %arg1: i32) -> (i32, i32) {
    %c0_i32 = arith.constant 0 : i32
    %c0_i32_0 = arith.constant 0 : i32
    return %arg0, %c0_i32 : i32, i32
  }
}

</mosaic_0001>

<bundles_post_ra>
// kernel: tpu_custom_call.1
= control target key start
LH: loop header
LB: loop body
LE: loop exit
PB: predicated region body
PF: predicated region fallthrough
CT: control target
= control target key end

     0   :  { %8 = vsyncpa [#allocation3], 0  ;;  %s255_s0 = inlined_call_operand.vmem [shape: f32[16,128], index: 0, kind: input, shape index: {}]   ;;  %s256_s1 = inlined_call_operand.hbm [shape: f32[16,128], index: 1, kind: input, shape index: {}]   ;;  %s257_s2 = inlined_call_operand.vmem [shape: f32[16,1], index: 2, kind: input, shape index: {}]   ;;  %s258_s3 = inlined_call_operand.hbm [shape: f32[8,128], index: 3, kind: output, shape index: {}]  }
   0x1   :  { %9 = vsyncpa [#allocation4], 0  ;;  %s212_s12 = smov [#allocation2]  }
   0x2   :  { %s29_s13 = sshll.u32 %s212_s12, 4  ;;  %s30_s13 = int_to_ptr.vmem [resolvable:$true] %s29_s13 }
   0x3   :  { %s176_s14 = scalar_lea.vmem %s30_s13, 256  ;;  %p181_p1 = scmp.lt.s32.totalorder %s30_s13, %s30_s13 }
   0x4   :  { %p177_p0 = scmp.ne.s32.totalorder %s30_s13, %s176_s14  ;;  %p182_p2 = scmp.lt.s32.totalorder %s176_s14, %s176_s14 }
   0x6   :  { %p183_p3 = por %p182_p2, %p181_p1 }
   0x8   :  { %p184_p4 = pnand %p183_p3, %p177_p0 }
   0xa   :  { %187 = shalt.err (!%p184_p4)
}
   0xb   :  { %s213_s15 = smov 128   ;;  %s214_s16 = smov 8  }
   0xc   :  { %35 = dma.hbm_to_vmem [thread:$0]  %s256_s1, 256, %s30_s13, [#allocation3], %s213_s15, %s213_s15, %s214_s16  }
   0xd   :  { %208 = dma.done.wait [#allocation3], 256  }
   0xe   :  { %209 = vsyncadd [#allocation3], 4294967040  ;;  %v215_v0 = vmov 0   ;;  %v92_v1 = vld [vmem:[%s257_s2] sm:$0xff]  ;;  %v93_v2 = vld [vmem:[%s257_s2 + $0x8] sm:$0xff]  ;;  %s216_s2 = smov [#allocation5]  }
   0xf   :  { %167 = vset.pattern.permute.xlu0 %v215_v0  ;;  %v84_v3 = vld [vmem:[%s255_s0] sm:$0xff]  ;;  %v85_v5 = vld [vmem:[%s255_s0 + $0x8] sm:$0xff]  ;;  %s140_s26 = sshll.u32 %s216_s2, 4  ;;  %s141_s26 = int_to_ptr.vmem [resolvable:$true] %s140_s26 }
  0x10   :  { %96 = vperm.xlu0 %167, %v92_v1   ;;  %v86_v4 = vld [vmem:[#allocation2] sm:$0xff]  ;;  %v87_v6 = vld [vmem:[#allocation2 + $0x8] sm:$0xff]  ;;  %s188_s27 = scalar_lea.vmem %s141_s26, 128  ;;  %p193_p6 = scmp.lt.s32.totalorder %s141_s26, %s141_s26 }
  0x11   :  { %v88_v7 = vsub.f32 %v84_v3, %v86_v4  ;;  %v89_v8 = vsub.f32 %v85_v5, %v87_v6  ;;  %p189_p5 = scmp.ne.s32.totalorder %s141_s26, %s188_s27  ;;  %p194_p7 = scmp.lt.s32.totalorder %s188_s27, %s188_s27 }
  0x13   :  { %v90_v10 = vand.u32 2147483647, %v88_v7  ;;  %v91_v11 = vand.u32 2147483647, %v89_v8  ;;  %p195_p8 = por %p194_p7, %p193_p6 }
  0x14   :  { %101 = vperm.xlu0 %167, %v93_v2  }
  0x15   :  { %p196_p9 = pnand %p195_p8, %p189_p5 }
  0x8b   :  { %v97_v9 = vpop.permute.xlu0 %96 }
  0x8c   :  { %v104_v13 = vmul.f32 %v97_v9, %v90_v10 }
  0x8f   :  { %v102_v12 = vpop.permute.xlu0 %101 }
  0x90   :  { %v105_v14 = vmul.f32 %v102_v12, %v91_v11 }
  0x92   :  { %v114_v15 = vadd.f32 %v105_v14, %v104_v13 }
  0x94   :  { %116 = vst [vmem:[#allocation5] sm:$0xff] %v114_v15 }
  0x95   :  { %199 = shalt.err (!%p196_p9)
}
  0x96   :  { %143 = dma.vmem_to_hbm [thread:$0]  %s141_s26, 128, %s258_s3, [#allocation4]  }
  0x97   :  { %210 = dma.done.wait [#allocation4], 128  }
  0x98   :  { %211 = vsyncadd [#allocation4], 4294967168 }
  0x99   :  { %147 = vsyncpa [#allocation3], 1 }
  0x9a   :  { %148 = vsyncpa [#allocation4], 1 }

</bundles_post_ra>
